<compile_context>
chip_gen: v6e
topology: v6e:2x2x1
jax: 0.10.0
libtpu: 0.0.40
codegen_flags: <defaults>
</compile_context>

<pallas_src>
import math

import jax
import jax.numpy as jnp
from jax.experimental import pallas as pl
from jax.experimental.pallas import tpu as pltpu

HID1 = 128        # first hidden layer (already lane-aligned)
HID2 = 64         # second hidden layer (logical size)
HID2_PAD = 128    # lane-dense padded size of the second hidden layer
LANE = 128
NEG_BIG = -1e30   # effectively -inf for softmax masking (finite => no NaN risk)


def _round_up(x, m):
    return ((x + m - 1) // m) * m


def _policy_kernel(x_ref, w1_ref, b1_ref, w2_ref, b2_ref, w3_ref, b3_ref, o_ref):
    """One batch tile: Linear+ReLU -> Linear+ReLU -> Linear -> Softmax."""
    cdt = w1_ref.dtype  # MXU compute dtype (bf16 by default)

    # ----- Linear(F, 128) + ReLU (f32 accumulation on the MXU) -----
    h1 = jnp.dot(x_ref[...], w1_ref[...], preferred_element_type=jnp.float32)
    h1 = jnp.maximum(h1 + b1_ref[...], 0.0)

    # ----- Linear(128, 64) + ReLU (zero-padded to 128 lanes) -----
    h2 = jnp.dot(h1.astype(cdt), w2_ref[...], preferred_element_type=jnp.float32)
    h2 = jnp.maximum(h2 + b2_ref[...], 0.0)

    # ----- Linear(64, A) (A padded to 128 lanes; padded bias = -1e30) -----
    logits = jnp.dot(h2.astype(cdt), w3_ref[...], preferred_element_type=jnp.float32)
    logits = logits + b3_ref[...]

    # ----- numerically stable softmax; padded columns exp() to exactly 0 -----
    m = jnp.max(logits, axis=-1, keepdims=True)
    e = jnp.exp(logits - m)
    denom = jnp.sum(e, axis=-1, keepdims=True)
    o_ref[...] = (e * pl.reciprocal(denom, approx=True)).astype(o_ref.dtype)


def policy_network_forward(x, params, *, block_b=1024, compute_dtype=jnp.bfloat16):
    """x: (B, F) float32. params: dict of w1,b1,w2,b2,w3,b3. Returns (B, A) probs."""
    w1, b1, w2, b2, w3, b3 = (
        params["w1"], params["b1"], params["w2"],
        params["b2"], params["w3"], params["b3"],
    )
    B, F = x.shape
    A = w3.shape[1]
    A_pad = _round_up(A, LANE)

    # --- lane-dense / MXU-friendly parameter padding (mathematically exact) ---
    w1p = w1.astype(compute_dtype)                                        # (F, 128)
    b1p = b1.astype(jnp.float32)                                          # (1, 128)
    w2p = jnp.zeros((HID1, HID2_PAD), compute_dtype).at[:, :HID2].set(
        w2.astype(compute_dtype))                                         # (128, 128)
    b2p = jnp.zeros((1, HID2_PAD), jnp.float32).at[:, :HID2].set(
        b2.astype(jnp.float32))                                           # (1, 128)
    w3p = jnp.zeros((HID2_PAD, A_pad), compute_dtype).at[:HID2, :A].set(
        w3.astype(compute_dtype))                                         # (128, A_pad)
    b3p = jnp.full((1, A_pad), NEG_BIG, jnp.float32).at[:, :A].set(
        b3.astype(jnp.float32))                                           # (1, A_pad)

    # --- batch tiling: pad B so every tile is full; params stay resident ---
    TB = min(block_b, _round_up(B, 8))
    B_pad = _round_up(B, TB)
    xp = x.astype(compute_dtype)
    if B_pad != B:
        xp = jnp.pad(xp, ((0, B_pad - B), (0, 0)))
    n_blocks = B_pad // TB

    # --- VMEM budget derived from the real footprint (fits v7x's 64 MiB) ---
    param_bytes = sum(int(a.size) * a.dtype.itemsize
                      for a in (w1p, b1p, w2p, b2p, w3p, b3p))
    x_tile_bytes = TB * F * jnp.dtype(compute_dtype).itemsize
    out_tile_bytes = TB * A_pad * 4
    inter_bytes = 2 * TB * (HID1 + HID2_PAD) * 4          # h1/h2 headroom
    vmem_bytes = 2 * (x_tile_bytes + out_tile_bytes + param_bytes) + inter_bytes
    vmem_limit = int(min(max(vmem_bytes + (4 << 20), 16 << 20), 48 << 20))

    cost = pl.CostEstimate(
        flops=int(2 * B_pad * (F * HID1 + HID1 * HID2_PAD + HID2_PAD * A_pad)),
        transcendentals=int(B_pad * (A_pad + 1)),
        bytes_accessed=int(xp.size) * xp.dtype.itemsize + B_pad * A_pad * 4 + param_bytes,
    )

    resident = lambda shape: pl.BlockSpec(shape, lambda i: (0, 0))

    out = pl.pallas_call(
        _policy_kernel,
        out_shape=jax.ShapeDtypeStruct((B_pad, A_pad), jnp.float32),
        grid=(n_blocks,),
        in_specs=[
            pl.BlockSpec((TB, F), lambda i: (i, 0)),        # x: streamed per batch tile
            resident(w1p.shape), resident(b1p.shape),        # params: pinned in VMEM
            resident(w2p.shape), resident(b2p.shape),
            resident(w3p.shape), resident(b3p.shape),
        ],
        out_specs=pl.BlockSpec((TB, A_pad), lambda i: (i, 0)),
        compiler_params=pltpu.CompilerParams(
            dimension_semantics=("parallel",),   # v7x: batch tiles across both TCs
            vmem_limit_bytes=vmem_limit,
        ),
        cost_estimate=cost,
    )(xp, w1p, b1p, w2p, b2p, w3p, b3p)

    return out[:B, :A]


def init_params(key, feature_dim, action_dim):
    """PyTorch-like nn.Linear init: U(-1/sqrt(in), 1/sqrt(in)).
    Weights stored as (in, out); biases as (1, out)."""
    ks = jax.random.split(key, 6)

    def linear(kw, kb, fan_in, fan_out):
        bound = 1.0 / math.sqrt(fan_in)
        w = jax.random.uniform(kw, (fan_in, fan_out), jnp.float32, -bound, bound)
        b = jax.random.uniform(kb, (1, fan_out), jnp.float32, -bound, bound)
        return w, b

    w1, b1 = linear(ks[0], ks[1], feature_dim, HID1)
    w2, b2 = linear(ks[2], ks[3], HID1, HID2)
    w3, b3 = linear(ks[4], ks[5], HID2, action_dim)
    return {"w1": w1, "b1": b1, "w2": w2, "b2": b2, "w3": w3, "b3": b3}


def _reference_forward(x, params):
    h1 = jnp.maximum(x @ params["w1"] + params["b1"], 0.0)
    h2 = jnp.maximum(h1 @ params["w2"] + params["b2"], 0.0)
    logits = h2 @ params["w3"] + params["b3"]
    return jax.nn.softmax(logits, axis=-1)


if __name__ == "__main__":
    key = jax.random.PRNGKey(0)
    k_x, k_p = jax.random.split(key)

    batch, feature_dim, action_dim = 8, 32, 8
    x = jax.random.normal(k_x, (batch, feature_dim), dtype=jnp.float32)
    params = init_params(k_p, feature_dim, action_dim)

    probs = policy_network_forward(x, params)
    jax.block_until_ready(probs)

    # sanity: shape, non-negativity, rows ~sum to 1 (bf16 MXU + approx recip)
    assert probs.shape == (batch, action_dim)
    row_sums = jnp.sum(probs, axis=-1)
    assert bool(jnp.all(jnp.abs(row_sums - 1.0) < 1e-2))
    assert bool(jnp.all(probs >= 0.0))

    # correctness vs. pure-JAX f32 reference (generous tol for bf16 compute)
    ref = _reference_forward(x, params)
    assert bool(jnp.max(jnp.abs(probs - ref)) < 5e-2)

    print("KERNEL_OK")
</pallas_src>

<mosaic_0001>
module attributes {stable_mosaic.version = 11 : i64} {
  func.func @_policy_kernel(%arg0: i32, %arg1: memref<8x32xbf16, #tpu.memory_space<vmem>>, %arg2: memref<32x128xbf16, #tpu.memory_space<vmem>>, %arg3: memref<1x128xf32, #tpu.memory_space<vmem>>, %arg4: memref<128x128xbf16, #tpu.memory_space<vmem>>, %arg5: memref<1x128xf32, #tpu.memory_space<vmem>>, %arg6: memref<128x128xbf16, #tpu.memory_space<vmem>>, %arg7: memref<1x128xf32, #tpu.memory_space<vmem>>, %arg8: memref<8x128xf32, #tpu.memory_space<vmem>>) attributes {dimension_semantics = [#tpu.dimension_semantics<parallel>], iteration_bounds = array<i64: 1>, scalar_prefetch = 0 : i64, scratch_operands = 0 : i64, tpu.core_type = #tpu.core_type<tc>, window_params = [{transform_indices = @transform_0, window_bounds = array<i64: 8, 32>}, {pipeline_mode = #tpu.pipeline_mode<synchronous>, transform_indices = @transform_1, window_bounds = array<i64: 32, 128>}, {pipeline_mode = #tpu.pipeline_mode<synchronous>, transform_indices = @transform_2, window_bounds = array<i64: 1, 128>}, {pipeline_mode = #tpu.pipeline_mode<synchronous>, transform_indices = @transform_3, window_bounds = array<i64: 128, 128>}, {pipeline_mode = #tpu.pipeline_mode<synchronous>, transform_indices = @transform_4, window_bounds = array<i64: 1, 128>}, {pipeline_mode = #tpu.pipeline_mode<synchronous>, transform_indices = @transform_5, window_bounds = array<i64: 128, 128>}, {pipeline_mode = #tpu.pipeline_mode<synchronous>, transform_indices = @transform_6, window_bounds = array<i64: 1, 128>}, {transform_indices = @transform_7, window_bounds = array<i64: 8, 128>}]} {
    %c0 = arith.constant 0 : index
    %c0_0 = arith.constant 0 : index
    %0 = vector.load %arg1[%c0, %c0_0] : memref<8x32xbf16, #tpu.memory_space<vmem>>, vector<8x32xbf16>
    %c0_1 = arith.constant 0 : index
    %c0_2 = arith.constant 0 : index
    %1 = vector.load %arg2[%c0_1, %c0_2] : memref<32x128xbf16, #tpu.memory_space<vmem>>, vector<32x128xbf16>
    %cst = arith.constant dense<0.000000e+00> : vector<8x128xf32>
    %2 = tpu.matmul %0, %1, %cst {dimension_numbers = #tpu.dot_dimension_numbers<[1], [0], [0], [1], [0, 0, 1, 1], [], []>} : vector<8x32xbf16>, vector<32x128xbf16>, vector<8x128xf32> -> vector<8x128xf32>
    %c0_3 = arith.constant 0 : index
    %c0_4 = arith.constant 0 : index
    %3 = vector.load %arg3[%c0_3, %c0_4] : memref<1x128xf32, #tpu.memory_space<vmem>>, vector<1x128xf32>
    %4 = vector.broadcast %3 : vector<1x128xf32> to vector<8x128xf32>
    %5 = arith.addf %2, %4 : vector<8x128xf32>
    %cst_5 = arith.constant 0.000000e+00 : f32
    %6 = vector.broadcast %cst_5 : f32 to vector<8x128xf32>
    %7 = arith.maximumf %5, %6 : vector<8x128xf32>
    %8 = arith.truncf %7 : vector<8x128xf32> to vector<8x128xbf16>
    %c0_6 = arith.constant 0 : index
    %c0_7 = arith.constant 0 : index
    %9 = vector.load %arg4[%c0_6, %c0_7] : memref<128x128xbf16, #tpu.memory_space<vmem>>, vector<128x128xbf16>
    %cst_8 = arith.constant dense<0.000000e+00> : vector<8x128xf32>
    %10 = tpu.matmul %8, %9, %cst_8 {dimension_numbers = #tpu.dot_dimension_numbers<[1], [0], [0], [1], [0, 0, 1, 1], [], []>} : vector<8x128xbf16>, vector<128x128xbf16>, vector<8x128xf32> -> vector<8x128xf32>
    %c0_9 = arith.constant 0 : index
    %c0_10 = arith.constant 0 : index
    %11 = vector.load %arg5[%c0_9, %c0_10] : memref<1x128xf32, #tpu.memory_space<vmem>>, vector<1x128xf32>
    %12 = vector.broadcast %11 : vector<1x128xf32> to vector<8x128xf32>
    %13 = arith.addf %10, %12 : vector<8x128xf32>
    %cst_11 = arith.constant 0.000000e+00 : f32
    %14 = vector.broadcast %cst_11 : f32 to vector<8x128xf32>
    %15 = arith.maximumf %13, %14 : vector<8x128xf32>
    %16 = arith.truncf %15 : vector<8x128xf32> to vector<8x128xbf16>
    %c0_12 = arith.constant 0 : index
    %c0_13 = arith.constant 0 : index
    %17 = vector.load %arg6[%c0_12, %c0_13] : memref<128x128xbf16, #tpu.memory_space<vmem>>, vector<128x128xbf16>
    %cst_14 = arith.constant dense<0.000000e+00> : vector<8x128xf32>
    %18 = tpu.matmul %16, %17, %cst_14 {dimension_numbers = #tpu.dot_dimension_numbers<[1], [0], [0], [1], [0, 0, 1, 1], [], []>} : vector<8x128xbf16>, vector<128x128xbf16>, vector<8x128xf32> -> vector<8x128xf32>
    %c0_15 = arith.constant 0 : index
    %c0_16 = arith.constant 0 : index
    %19 = vector.load %arg7[%c0_15, %c0_16] : memref<1x128xf32, #tpu.memory_space<vmem>>, vector<1x128xf32>
    %20 = vector.broadcast %19 : vector<1x128xf32> to vector<8x128xf32>
    %21 = arith.addf %18, %20 : vector<8x128xf32>
    %cst_17 = arith.constant dense<0xFF800000> : vector<8xf32>
    %22 = vector.multi_reduction <maximumf>, %21, %cst_17 [1] : vector<8x128xf32> to vector<8xf32>
    %23 = vector.shape_cast %22 : vector<8xf32> to vector<8x1xf32>
    %24 = vector.broadcast %23 : vector<8x1xf32> to vector<8x128xf32>
    %25 = arith.subf %21, %24 : vector<8x128xf32>
    %26 = math.exp %25 : vector<8x128xf32>
    %cst_18 = arith.constant dense<0.000000e+00> : vector<8xf32>
    %27 = vector.multi_reduction <add>, %26, %cst_18 [1] : vector<8x128xf32> to vector<8xf32>
    %28 = vector.shape_cast %27 : vector<8xf32> to vector<8x1xf32>
    %29 = tpu.reciprocal %28 {approx = true} : vector<8x1xf32> -> vector<8x1xf32>
    %30 = vector.broadcast %29 : vector<8x1xf32> to vector<8x128xf32>
    %31 = arith.mulf %26, %30 : vector<8x128xf32>
    %c0_19 = arith.constant 0 : index
    %c0_20 = arith.constant 0 : index
    %32 = vector.load %arg8[%c0_19, %c0_20] : memref<8x128xf32, #tpu.memory_space<vmem>>, vector<8x128xf32>
    tpu.vector_store %arg8[%c0_19, %c0_20], %31 {strides = array<i32>} : memref<8x128xf32, #tpu.memory_space<vmem>>, vector<8x128xf32>,
    return
  }
  func.func @transform_0(%arg0: i32) -> (i32, i32) {
    %c0_i32 = arith.constant 0 : i32
    %c0_i32_0 = arith.constant 0 : i32
    return %arg0, %c0_i32 : i32, i32
  }
  func.func @transform_1(%arg0: i32) -> (i32, i32) {
    %c0_i32 = arith.constant 0 : i32
    %c0_i32_0 = arith.constant 0 : i32
    %c0_i32_1 = arith.constant 0 : i32
    return %c0_i32, %c0_i32_0 : i32, i32
  }
  func.func @transform_2(%arg0: i32) -> (i32, i32) {
    %c0_i32 = arith.constant 0 : i32
    %c0_i32_0 = arith.constant 0 : i32
    %c0_i32_1 = arith.constant 0 : i32
    return %c0_i32, %c0_i32_0 : i32, i32
  }
  func.func @transform_3(%arg0: i32) -> (i32, i32) {
    %c0_i32 = arith.constant 0 : i32
    %c0_i32_0 = arith.constant 0 : i32
    %c0_i32_1 = arith.constant 0 : i32
    return %c0_i32, %c0_i32_0 : i32, i32
  }
  func.func @transform_4(%arg0: i32) -> (i32, i32) {
    %c0_i32 = arith.constant 0 : i32
    %c0_i32_0 = arith.constant 0 : i32
    %c0_i32_1 = arith.constant 0 : i32
    return %c0_i32, %c0_i32_0 : i32, i32
  }
  func.func @transform_5(%arg0: i32) -> (i32, i32) {
    %c0_i32 = arith.constant 0 : i32
    %c0_i32_0 = arith.constant 0 : i32
    %c0_i32_1 = arith.constant 0 : i32
    return %c0_i32, %c0_i32_0 : i32, i32
  }
  func.func @transform_6(%arg0: i32) -> (i32, i32) {
    %c0_i32 = arith.constant 0 : i32
    %c0_i32_0 = arith.constant 0 : i32
    %c0_i32_1 = arith.constant 0 : i32
    return %c0_i32, %c0_i32_0 : i32, i32
  }
  func.func @transform_7(%arg0: i32) -> (i32, i32) {
    %c0_i32 = arith.constant 0 : i32
    %c0_i32_0 = arith.constant 0 : i32
    return %arg0, %c0_i32 : i32, i32
  }
}

</mosaic_0001>

<bundles_post_ra>
// kernel: tpu_custom_call.1
= control target key start
LH: loop header
LB: loop body
LE: loop exit
PB: predicated region body
PF: predicated region fallthrough
CT: control target
= control target key end

     0   :  { %12 = vsyncpa [#allocation3], 0  ;;  %s738_s0 = inlined_call_operand.hbm [shape: bf16[8,32], index: 0, kind: input, shape index: {}]   ;;  %s739_s1 = inlined_call_operand.hbm [shape: bf16[32,128], index: 1, kind: input, shape index: {}]   ;;  %s740_s2 = inlined_call_operand.vmem [shape: f32[1,128], index: 2, kind: input, shape index: {}]   ;;  %s741_s3 = inlined_call_operand.hbm [shape: bf16[128,128], index: 3, kind: input, shape index: {}]   ;;  %s742_s4 = inlined_call_operand.vmem [shape: f32[1,128], index: 4, kind: input, shape index: {}]   ;;  %s743_s5 = inlined_call_operand.hbm [shape: bf16[128,128], index: 5, kind: input, shape index: {}]   ;;  %s744_s6 = inlined_call_operand.vmem [shape: f32[1,128], index: 6, kind: input, shape index: {}]   ;;  %s745_s7 = inlined_call_operand.hbm [shape: f32[8,128], index: 7, kind: output, shape index: {}]  }
   0x1   :  { %13 = vsyncpa [#allocation6], 0 }
   0x2   :  { %14 = vsyncpa [#allocation9], 0 }
   0x3   :  { %15 = vsyncpa [#allocation4], 0  ;;  %s632_s24 = smov [#allocation5]  }
   0x4   :  { %s31_s25 = sshll.u32 %s632_s24, 4  ;;  %s32_s25 = int_to_ptr.vmem [resolvable:$true] %s31_s25 }
   0x5   :  { %s532_s26 = scalar_lea.vmem %s32_s25, 256  ;;  %p537_p1 = scmp.lt.s32.totalorder %s32_s25, %s32_s25 }
   0x6   :  { %p533_p0 = scmp.ne.s32.totalorder %s32_s25, %s532_s26  ;;  %p538_p2 = scmp.lt.s32.totalorder %s532_s26, %s532_s26 }
   0x8   :  { %p539_p3 = por %p538_p2, %p537_p1 }
   0xa   :  { %p540_p4 = pnand %p539_p3, %p533_p0 }
   0xc   :  { %543 = shalt.err (!%p540_p4)
}
   0xd   :  { %s633_s27 = smov 64   ;;  %s634_s28 = smov 4  }
   0xe   :  { %37 = dma.hbm_to_vmem [thread:$0]  %s739_s1, 256, %s32_s25, [#allocation6], %s633_s27, %s633_s27, %s634_s28  }
   0xf   :  { %s635_s8 = smov [#allocation2]   ;;  %s636_s10 = smov [#allocation7]  }
  0x10   :  { %s22_s9 = sshll.u32 %s635_s8, 4  ;;  %s45_s11 = sshll.u32 %s636_s10, 4  ;;  %s23_s9 = int_to_ptr.vmem [resolvable:$true] %s22_s9  ;;  %s46_s11 = int_to_ptr.vmem [resolvable:$true] %s45_s11 }
  0x11   :  { %s552_s12 = scalar_lea.vmem %s23_s9, 64  ;;  %p557_p6 = scmp.lt.s32.totalorder %s23_s9, %s23_s9 }
  0x12   :  { %p553_p5 = scmp.ne.s32.totalorder %s23_s9, %s552_s12  ;;  %p558_p7 = scmp.lt.s32.totalorder %s552_s12, %s552_s12 }
  0x14   :  { %p559_p8 = por %p558_p7, %p557_p6 }
  0x16   :  { %p560_p9 = pnand %p559_p8, %p553_p5 }
  0x18   :  { %563 = shalt.err (!%p560_p9)
}
  0x19   :  { %25 = dma.hbm_to_vmem [thread:$0]  %s738_s0, 64, %s23_s9, [#allocation3]  }
  0x1a   :  { %s572_s15 = scalar_lea.vmem %s46_s11, 1024  ;;  %p577_p11 = scmp.lt.s32.totalorder %s46_s11, %s46_s11 }
  0x1b   :  { %p573_p10 = scmp.ne.s32.totalorder %s46_s11, %s572_s15  ;;  %p578_p12 = scmp.lt.s32.totalorder %s572_s15, %s572_s15 }
  0x1d   :  { %p579_p13 = por %p578_p12, %p577_p11 }
  0x1f   :  { %p580_p0 = pnand %p579_p13, %p573_p10 }
  0x21   :  { %583 = shalt.err (!%p580_p0)
}
  0x22   :  { %51 = dma.hbm_to_vmem [thread:$0]  %s741_s3, 1024, %s46_s11, [#allocation6], %s633_s27, %s633_s27, %s634_s28  }
  0x23   :  { %s637_s17 = smov [#allocation8]  }
  0x24   :  { %s59_s18 = sshll.u32 %s637_s17, 4  ;;  %s60_s18 = int_to_ptr.vmem [resolvable:$true] %s59_s18 }
  0x25   :  { %s592_s19 = scalar_lea.vmem %s60_s18, 1024  ;;  %p597_p2 = scmp.lt.s32.totalorder %s60_s18, %s60_s18 }
  0x26   :  { %p593_p1 = scmp.ne.s32.totalorder %s60_s18, %s592_s19  ;;  %p598_p3 = scmp.lt.s32.totalorder %s592_s19, %s592_s19 }
  0x28   :  { %p599_p4 = por %p598_p3, %p597_p2 }
  0x2a   :  { %p600_p5 = pnand %p599_p4, %p593_p1 }
  0x2c   :  { %603 = shalt.err (!%p600_p5)
}
  0x2d   :  { %65 = dma.hbm_to_vmem [thread:$0]  %s743_s5, 1024, %s60_s18, [#allocation9], %s633_s27, %s633_s27, %s634_s28  }
  0x2e   :  { %624 = dma.done.wait [#allocation3], 64  }
  0x2f   :  { %625 = vsyncadd [#allocation3], 4294967232 }
  0x30   :  { %626 = dma.done.wait [#allocation6], 1280  }
  0x31   :  { %627 = vsyncadd [#allocation6], 4294966016 }
  0x32   :  { %628 = dma.done.wait [#allocation9], 1024  }
  0x33   :  { %629 = vsyncadd [#allocation9], 4294966272  ;;  %v638_v0 = vmov 0.0   ;;  %vm639_vm0 = vmmov 0   ;;  %v502_v1 = vld [vmem:[#allocation5 + $0x8] sm:$0xff]   ;;  %v503_v2 = vld [vmem:[#allocation5] sm:$0xff]  }
  0x34   :  { %445 = vmatprep.subr.bf16.mxu0 %v638_v0  ;;  %449 = vmatprep.mubr.msk.bf16.mxu0 %vm639_vm0, %v638_v0  ;;  %v504_v3 = vld [vmem:[#allocation7 + $0x38] sm:$0xff]   ;;  %vm105_vm1 = vcmask 261120   ;;  %v505_v4 = vld [vmem:[#allocation7 + $0x30] sm:$0xff]   ;;  %v81_v5 = vld [vmem:[#allocation2] sm:$0xf] }
  0x35   :  { %453 = vmatprep.subr.bf16.mxu1 %v638_v0  ;;  %469 = vmatprep.mubr.msk.bf16.mxu1 %vm639_vm0, %v638_v0  ;;  %v506_v6 = vld [vmem:[#allocation7 + $0x28] sm:$0xff]   ;;  %v507_v7 = vld [vmem:[#allocation7 + $0x20] sm:$0xff]   ;;  %v508_v8 = vld [vmem:[#allocation7 + $0x18] sm:$0xff]  }
  0x36   :  { %446 = vmatpush3.bf16.msra.mxu0 %v502_v1  ;;  %454 = vmatpush3.bf16.msra.mxu1 %v504_v3  ;;  %v509_v9 = vld [vmem:[#allocation7 + $0x10] sm:$0xff]   ;;  %v510_v10 = vld [vmem:[#allocation7 + $0x8] sm:$0xff]   ;;  %v511_v11 = vld [vmem:[#allocation7] sm:$0xff]  }
  0x37   :  { %447 = vmatprep.subr.bf16.mxu0 %v638_v0  ;;  %455 = vmatprep.subr.bf16.mxu1 %v638_v0  ;;  %v512_v12 = vld [vmem:[#allocation8 + $0x38] sm:$0xff]   ;;  %v513_v13 = vld [vmem:[#allocation8 + $0x30] sm:$0xff]   ;;  %v514_v14 = vld [vmem:[#allocation8 + $0x28] sm:$0xff]  }
  0x38   :  { %v515_v15 = vld [vmem:[#allocation8 + $0x20] sm:$0xff]   ;;  %v516_v16 = vld [vmem:[#allocation8 + $0x18] sm:$0xff]   ;;  %v517_v17 = vld [vmem:[#allocation8 + $0x10] sm:$0xff]  }
  0x39   :  { %v402_v18 = vld [vmem:[%s740_s2] ss:$0 sm:$0xff]  ;;  %v519_v27 = vld [vmem:[#allocation8] sm:$0xff]  }
  0x3a   :  { %448 = vmatpush3.bf16.msra.mxu0 %v503_v2  ;;  %456 = vmatpush3.bf16.msra.mxu1 %v505_v4  ;;  %v518_v26 = vld [vmem:[#allocation8 + $0x8] sm:$0xff]  }
  0x3b   :  { %473 = vmatprep.subr.bf16.mxu0 %v638_v0  ;;  %457 = vmatprep.subr.bf16.mxu1 %v638_v0  ;;  %v406_v28 = vld [vmem:[%s742_s4] ss:$0 sm:$0xff]  ;;  %s640_s4 = smov [#allocation10]  }
  0x3c   :  { %v415_v36 = vld [vmem:[%s744_s6] ss:$0 sm:$0xff]  ;;  %s391_s24 = sshll.u32 %s640_s4, 4  ;;  %s392_s24 = int_to_ptr.vmem [resolvable:$true] %s391_s24 }
  0x3d   :  { %450 = vmatmul.mubr.msk.bf16.vlgmr.msra.gmra.mxu0 %vm105_vm1, %v81_v5  ;;  %s604_s6 = scalar_lea.vmem %s392_s24, 128  ;;  %p609_p7 = scmp.lt.s32.totalorder %s392_s24, %s392_s24 }
  0x3e   :  { %489 = vmatprep.mubr.msk.bf16.mxu0 %vm639_vm0, %v638_v0  ;;  %458 = vmatpush3.bf16.msra.mxu1 %v506_v6  ;;  %p605_p6 = scmp.ne.s32.totalorder %s392_s24, %s604_s6  ;;  %p610_p8 = scmp.lt.s32.totalorder %s604_s6, %s604_s6 }
  0x3f   :  { %459 = vmatprep.subr.bf16.mxu1 %v638_v0  ;;  %474 = vmatpush3.bf16.msra.mxu0 %v512_v12 }
  0x40   :  { %475 = vmatprep.subr.bf16.mxu0 %v638_v0  ;;  %p611_p9 = por %p610_p8, %p609_p7 }
  0x42   :  { %460 = vmatpush3.bf16.msra.mxu1 %v507_v7  ;;  %p612_p10 = pnand %p611_p9, %p605_p6 }
  0x43   :  { %461 = vmatprep.subr.bf16.mxu1 %v638_v0  ;;  %476 = vmatpush3.bf16.msra.mxu0 %v513_v13 }
  0x44   :  { %477 = vmatprep.subr.bf16.mxu0 %v638_v0 }
  0x46   :  { %462 = vmatpush3.bf16.msra.mxu1 %v508_v8 }
  0x47   :  { %463 = vmatprep.subr.bf16.mxu1 %v638_v0  ;;  %478 = vmatpush3.bf16.msra.mxu0 %v514_v14 }
  0x48   :  { %479 = vmatprep.subr.bf16.mxu0 %v638_v0 }
  0x4a   :  { %464 = vmatpush3.bf16.msra.mxu1 %v509_v9 }
  0x4b   :  { %465 = vmatprep.subr.bf16.mxu1 %v638_v0  ;;  %480 = vmatpush3.bf16.msra.mxu0 %v515_v15 }
  0x4c   :  { %481 = vmatprep.subr.bf16.mxu0 %v638_v0 }
  0x4e   :  { %466 = vmatpush3.bf16.msra.mxu1 %v510_v10 }
  0x4f   :  { %467 = vmatprep.subr.bf16.mxu1 %v638_v0  ;;  %482 = vmatpush3.bf16.msra.mxu0 %v516_v16 }
  0x50   :  { %483 = vmatprep.subr.bf16.mxu0 %v638_v0 }
  0x52   :  { %468 = vmatpush3.bf16.msra.mxu1 %v511_v11 }
  0x53   :  { %484 = vmatpush3.bf16.msra.mxu0 %v517_v17 }
  0x54   :  { %485 = vmatprep.subr.bf16.mxu0 %v638_v0 }
  0x57   :  { %486 = vmatpush3.bf16.msra.mxu0 %v518_v26 }
  0x58   :  { %487 = vmatprep.subr.bf16.mxu0 %v638_v0 }
  0x5b   :  { %488 = vmatpush3.bf16.msra.mxu0 %v519_v27 }
  0xfd   :  { %v143_v19 = vpop.f32.mrf.mxu0 }
  0xfe   :  { %v144_v20 = vadd.f32 %v402_v18, %v143_v19 }
  0xff   :  { %v451_v21 = vpop.f32.mrf.mxu0 }
 0x100   :  { %v149_v22 = vmax.f32 %v144_v20, 0.0 }
 0x101   :  { %v146_v23 = vpop.f32.mrf.mxu0 }
 0x102   :  { %v150_v24 = vpack.c.bf16 %v149_v22, %v149_v22 }
 0x103   :  { %v452_v25 = vpop.f32.mrf.mxu0 }
 0x104   :  { %470 = vmatmul.mubr.bf16.vlgmr.msra.gmra.mxu1 %v150_v24 }
 0x1c4   :  { %v256_v29 = vpop.f32.mrf.mxu1 }
 0x1c5   :  { %v257_v30 = vadd.f32 %v406_v28, %v256_v29 }
 0x1c6   :  { %v471_v31 = vpop.f32.mrf.mxu1 }
 0x1c7   :  { %v262_v32 = vmax.f32 %v257_v30, 0.0 }
 0x1c8   :  { %v259_v33 = vpop.f32.mrf.mxu1 }
 0x1c9   :  { %v263_v34 = vpack.c.bf16 %v262_v32, %v262_v32 }
 0x1ca   :  { %v472_v35 = vpop.f32.mrf.mxu1 }
 0x1cb   :  { %490 = vmatmul.mubr.bf16.vlgmr.msra.gmra.mxu0 %v263_v34 }
 0x28b   :  { %v369_v37 = vpop.f32.mrf.mxu0 }
 0x28c   :  { %v370_v38 = vadd.f32 %v415_v36, %v369_v37 }
 0x28d   :  { %v491_v39 = vpop.f32.mrf.mxu0 }
 0x28e   :  { %375 = vmax.xlane.f32.xlu0 %v370_v38 }
 0x28f   :  { %v372_v40 = vpop.f32.mrf.mxu0 }
 0x291   :  { %v492_v41 = vpop.f32.mrf.mxu0 }
 0x317   :  { %v376_v42 = vpop.xlane.xlu0 %375 }
 0x318   :  { %v377_v43 = vsub.f32 %v370_v38, %v376_v42 }
 0x31a   :  { %v378_v44 = vmul.f32 1.442695, %v377_v43 }
 0x31c   :  { %520 = vpow2.f32 %v378_v44 }
 0x329   :  { %v521_v45 = vpop.eup %520 }
 0x32a   :  { %380 = vadd.xlane.f32.xlu0 %v521_v45 }
 0x3b3   :  { %v381_v46 = vpop.xlane.xlu0 %380 }
 0x3b4   :  { %522 = vrcp.f32 %v381_v46 }
 0x3c1   :  { %v523_v47 = vpop.eup %522 }
 0x3c2   :  { %v383_v48 = vmul.f32 %v523_v47, %v521_v45 }
 0x3c4   :  { %384 = vst [vmem:[#allocation10] sm:$0xff] %v383_v48 }
 0x3c5   :  { %615 = shalt.err (!%p612_p10)
}
 0x3c6   :  { %394 = dma.vmem_to_hbm [thread:$0]  %s392_s24, 128, %s745_s7, [#allocation4]  }
 0x3c7   :  { %630 = dma.done.wait [#allocation4], 128  }
 0x3c8   :  { %631 = vsyncadd [#allocation4], 4294967168 }
 0x3c9   :  { %398 = vsyncpa [#allocation3], 1 }
 0x3ca   :  { %399 = vsyncpa [#allocation6], 1 }
 0x3cb   :  { %400 = vsyncpa [#allocation9], 1 }
 0x3cc   :  { %401 = vsyncpa [#allocation4], 1 }

</bundles_post_ra>
